<compile_context>
chip_gen: v7x
topology: tpu7x:2x2x1
jax: 0.10.0
libtpu: 0.0.40
codegen_flags: <defaults>
</compile_context>

<pallas_src>
import functools

import jax
import jax.numpy as jnp
from jax import lax
from jax.experimental import pallas as pl
from jax.experimental.pallas import tpu as pltpu


def _encoder_kernel(seq_ref, h0_ref, c0_ref, wp_ref, bp_ref,
                    wih_ref, b_ref, whh_ref, out_ref, gih_ref,
                    *, num_steps, batch, hidden):
    T, Bp, H = num_steps, batch, hidden

    # ---- hoisted, batched input path (independent of the h/c carry) ----
    x = seq_ref[...]                                              # (T*Bp, I)
    p = jnp.tanh(
        jnp.dot(x, wp_ref[...], preferred_element_type=jnp.float32)
        + bp_ref[...]
    )                                                             # (T*Bp, H) f32
    # One fused (T*Bp, H) @ (H, 4H) matmul; combined bias added once.
    # Gate order along 4H: [i, f, g, o] (PyTorch).
    gih_ref[...] = (
        jnp.dot(p.astype(wih_ref.dtype), wih_ref[...],
                preferred_element_type=jnp.float32)
        + b_ref[...]
    )                                                             # (T*Bp, 4H) f32

    whh = whh_ref[...]            # (H, 4H) loop-invariant, stays resident
    h = h0_ref[...]               # (Bp, H) f32
    c = c0_ref[...]               # (Bp, H) f32

    def step(t, carry):
        h, c = carry
        if isinstance(t, int):
            start = t * Bp                                  # static, aligned
        else:
            start = pl.multiple_of(t * Bp, Bp)              # dynamic, aligned
        g_t = gih_ref[pl.ds(start, Bp), :]                  # (Bp, 4H)

        # Single fused recurrent matmul per step (one 128-wide MXU tile).
        pre = g_t + jnp.dot(h.astype(whh.dtype), whh,
                            preferred_element_type=jnp.float32)   # (Bp, 4H)

        # 2 EUP passes for the gates + 1 for tanh(c)  (was 5).
        sig = jax.nn.sigmoid(pre)                                 # (Bp, 4H)
        g_gate = jnp.tanh(pre[:, 2 * H:3 * H])                    # (Bp, H)
        i_gate = sig[:, 0 * H:1 * H]
        f_gate = sig[:, 1 * H:2 * H]
        o_gate = sig[:, 3 * H:4 * H]

        c_new = f_gate * c + i_gate * g_gate
        h_new = o_gate * jnp.tanh(c_new)
        return h_new, c_new

    if T <= 32:
        # Small T: fully unrolled, static tile-aligned slices.
        for t in range(T):
            h, c = step(t, (h, c))
    else:
        # Large T: visible loop bounds instruction count and live ranges.
        h, c = lax.fori_loop(0, T, step, (h, c), unroll=4)

    out_ref[...] = h.astype(out_ref.dtype)


def match_history_encoder(seq, h0, c0, wp, bp, wih, whh, b_ih, b_hh, *,
                          matmul_dtype=jnp.float32):
    """seq: (T, B, I); h0/c0: (B, H).  Returns (B, H) == ys[-1] of the LSTM."""
    T, B, I = seq.shape
    H = h0.shape[-1]

    if T == 0:  # PyTorch forward: empty sequence returns the initial hidden.
        return h0

    mm = jnp.dtype(matmul_dtype)

    # Pad batch up to a sublane multiple (>= 8) so every per-step slab of the
    # precomputed input gates is 8-row aligned and the recurrent matmul has
    # full sublane occupancy. Padded rows are independent and sliced off.
    Bp = max(8, -(-B // 8) * 8)
    pad = Bp - B
    if pad:
        seq = jnp.pad(seq, ((0, 0), (0, pad), (0, 0)))
        h0 = jnp.pad(h0, ((0, pad), (0, 0)))
        c0 = jnp.pad(c0, ((0, pad), (0, 0)))

    seq2d = seq.reshape(T * Bp, I).astype(mm)      # row-major (time, batch)
    wp_m = wp.astype(mm)                           # (I, H)
    wih_m = wih.astype(mm)                         # (H, 4H) fused, [i,f,g,o]
    whh_m = whh.astype(mm)                         # (H, 4H) fused
    bp2 = bp.reshape(1, H).astype(jnp.float32)
    b4 = (b_ih + b_hh).reshape(1, 4 * H).astype(jnp.float32)
    h0f = h0.astype(jnp.float32)
    c0f = c0.astype(jnp.float32)

    kernel = functools.partial(_encoder_kernel, num_steps=T, batch=Bp, hidden=H)

    # Advisory cost hint for the XLA scheduler around this serial kernel.
    flops = (2 * T * Bp * I * H            # projection
             + 2 * T * Bp * H * 4 * H      # batched input-gate matmul
             + 2 * T * Bp * H * 4 * H      # recurrent matmuls (serial)
             + 12 * T * Bp * H)            # gate / cell elementwise
    transcendentals = 7 * T * Bp * H       # proj tanh + per-step sig/tanh
    bytes_accessed = (seq2d.size * mm.itemsize
                      + (wp_m.size + wih_m.size + whh_m.size) * mm.itemsize
                      + (h0f.size + c0f.size + bp2.size + b4.size + Bp * H) * 4)
    scratch_bytes = T * Bp * 4 * H * 4

    # Everything-resident design: bound VMEM explicitly (headroom + padding
    # factor), capped below every generation's scoped default.
    vmem_limit = int(min(32 * 1024 * 1024,
                         max(8 * 1024 * 1024,
                             8 * (bytes_accessed + scratch_bytes))))

    out = pl.pallas_call(
        kernel,
        out_shape=jax.ShapeDtypeStruct((Bp, H), jnp.float32),
        in_specs=[pl.BlockSpec(memory_space=pltpu.MemorySpace.VMEM)
                  for _ in range(8)],
        out_specs=pl.BlockSpec(memory_space=pltpu.MemorySpace.VMEM),
        scratch_shapes=[pltpu.VMEM((T * Bp, 4 * H), jnp.float32)],
        compiler_params=pltpu.CompilerParams(vmem_limit_bytes=vmem_limit),
        cost_estimate=pl.CostEstimate(flops=int(flops),
                                      transcendentals=int(transcendentals),
                                      bytes_accessed=int(bytes_accessed)),
    )(seq2d, h0f, c0f, wp_m, bp2, wih_m, b4, whh_m)

    return out[:B]


def match_history_encoder_ref(seq, h0, c0, wp, bp, wih, whh, b_ih, b_hh):
    """Pure-JAX reference (mirrors the PyTorch forward)."""
    p = jnp.tanh(seq @ wp + bp)                    # (T, B, H)
    b = b_ih + b_hh

    def step(carry, x):
        h, c = carry
        gates = x @ wih + h @ whh + b
        i, f, g, o = jnp.split(gates, 4, axis=-1)
        i = jax.nn.sigmoid(i)
        f = jax.nn.sigmoid(f)
        g = jnp.tanh(g)
        o = jax.nn.sigmoid(o)
        c = f * c + i * g
        h = o * jnp.tanh(c)
        return (h, c), h

    (h, _), _ = lax.scan(step, (h0, c0), p)
    return h


if __name__ == "__main__":
    T, B, I, H = 8, 2, 16, 32  # seq_len, batch, input_size, hidden_size

    key = jax.random.PRNGKey(0)
    ks = jax.random.split(key, 9)

    seq = jax.random.normal(ks[0], (T, B, I), dtype=jnp.float32)
    # _init_hidden gives zeros; small random values exercise the carry path.
    h0 = 0.1 * jax.random.normal(ks[1], (B, H), dtype=jnp.float32)
    c0 = 0.1 * jax.random.normal(ks[2], (B, H), dtype=jnp.float32)

    # Synthetic parameters, pre-transposed for right-multiply.
    wp = 0.1 * jax.random.normal(ks[3], (I, H), dtype=jnp.float32)       # Linear weight^T
    bp = 0.1 * jax.random.normal(ks[4], (H,), dtype=jnp.float32)
    wih = 0.1 * jax.random.normal(ks[5], (H, 4 * H), dtype=jnp.float32)  # W_ih^T
    whh = 0.1 * jax.random.normal(ks[6], (H, 4 * H), dtype=jnp.float32)  # W_hh^T
    b_ih = 0.1 * jax.random.normal(ks[7], (4 * H,), dtype=jnp.float32)
    b_hh = 0.1 * jax.random.normal(ks[8], (4 * H,), dtype=jnp.float32)

    ref = match_history_encoder_ref(seq, h0, c0, wp, bp, wih, whh, b_ih, b_hh)

    # f32 matmul operands: exact match against the f32 reference.
    out = match_history_encoder(seq, h0, c0, wp, bp, wih, whh, b_ih, b_hh,
                                matmul_dtype=jnp.float32)
    out = jax.block_until_ready(out)
    assert out.shape == (B, H)
    assert jnp.allclose(out, ref, atol=1e-5, rtol=1e-5), "f32 mismatch vs reference"

    # bf16 matmul operands (v6e/v7x MXU-native path), f32 accumulation and
    # f32 elementwise gate math; looser tolerance (error compounds over T).
    out_bf16 = match_history_encoder(seq, h0, c0, wp, bp, wih, whh, b_ih, b_hh,
                                     matmul_dtype=jnp.bfloat16)
    out_bf16 = jax.block_until_ready(out_bf16)
    assert out_bf16.shape == (B, H)
    assert jnp.allclose(out_bf16, ref, atol=5e-2, rtol=5e-2), "bf16 mismatch vs reference"

    print("KERNEL_OK")
</pallas_src>

<mosaic_0001>
module attributes {stable_mosaic.version = 11 : i64} {
  func.func @_encoder_kernel(%arg0: memref<64x16xf32, #tpu.memory_space<vmem>>, %arg1: memref<8x32xf32, #tpu.memory_space<vmem>>, %arg2: memref<8x32xf32, #tpu.memory_space<vmem>>, %arg3: memref<16x32xf32, #tpu.memory_space<vmem>>, %arg4: memref<1x32xf32, #tpu.memory_space<vmem>>, %arg5: memref<32x128xf32, #tpu.memory_space<vmem>>, %arg6: memref<1x128xf32, #tpu.memory_space<vmem>>, %arg7: memref<32x128xf32, #tpu.memory_space<vmem>>, %arg8: memref<8x32xf32, #tpu.memory_space<vmem>>, %arg9: memref<64x128xf32, #tpu.memory_space<vmem>>) attributes {dimension_semantics = [], scalar_prefetch = 0 : i64, scratch_operands = 1 : i64, tpu.core_type = #tpu.core_type<tc>} {
    %c0 = arith.constant 0 : index
    %c0_0 = arith.constant 0 : index
    %0 = vector.load %arg0[%c0, %c0_0] : memref<64x16xf32, #tpu.memory_space<vmem>>, vector<64x16xf32>
    %c0_1 = arith.constant 0 : index
    %c0_2 = arith.constant 0 : index
    %1 = vector.load %arg3[%c0_1, %c0_2] : memref<16x32xf32, #tpu.memory_space<vmem>>, vector<16x32xf32>
    %cst = arith.constant dense<0.000000e+00> : vector<64x32xf32>
    %2 = tpu.matmul %0, %1, %cst {dimension_numbers = #tpu.dot_dimension_numbers<[1], [0], [0], [1], [0, 0, 1, 1], [], []>} : vector<64x16xf32>, vector<16x32xf32>, vector<64x32xf32> -> vector<64x32xf32>
    %c0_3 = arith.constant 0 : index
    %c0_4 = arith.constant 0 : index
    %3 = vector.load %arg4[%c0_3, %c0_4] : memref<1x32xf32, #tpu.memory_space<vmem>>, vector<1x32xf32>
    %4 = vector.broadcast %3 : vector<1x32xf32> to vector<64x32xf32>
    %5 = arith.addf %2, %4 : vector<64x32xf32>
    %6 = math.tanh %5 : vector<64x32xf32>
    %c0_5 = arith.constant 0 : index
    %c0_6 = arith.constant 0 : index
    %7 = vector.load %arg5[%c0_5, %c0_6] : memref<32x128xf32, #tpu.memory_space<vmem>>, vector<32x128xf32>
    %cst_7 = arith.constant dense<0.000000e+00> : vector<64x128xf32>
    %8 = tpu.matmul %6, %7, %cst_7 {dimension_numbers = #tpu.dot_dimension_numbers<[1], [0], [0], [1], [0, 0, 1, 1], [], []>} : vector<64x32xf32>, vector<32x128xf32>, vector<64x128xf32> -> vector<64x128xf32>
    %c0_8 = arith.constant 0 : index
    %c0_9 = arith.constant 0 : index
    %9 = vector.load %arg6[%c0_8, %c0_9] : memref<1x128xf32, #tpu.memory_space<vmem>>, vector<1x128xf32>
    %10 = vector.broadcast %9 : vector<1x128xf32> to vector<64x128xf32>
    %11 = arith.addf %8, %10 : vector<64x128xf32>
    %c0_10 = arith.constant 0 : index
    %c0_11 = arith.constant 0 : index
    %12 = vector.load %arg9[%c0_10, %c0_11] : memref<64x128xf32, #tpu.memory_space<vmem>>, vector<64x128xf32>
    tpu.vector_store %arg9[%c0_10, %c0_11], %11 {strides = array<i32>} : memref<64x128xf32, #tpu.memory_space<vmem>>, vector<64x128xf32>,
    %c0_12 = arith.constant 0 : index
    %c0_13 = arith.constant 0 : index
    %13 = vector.load %arg7[%c0_12, %c0_13] : memref<32x128xf32, #tpu.memory_space<vmem>>, vector<32x128xf32>
    %c0_14 = arith.constant 0 : index
    %c0_15 = arith.constant 0 : index
    %14 = vector.load %arg1[%c0_14, %c0_15] : memref<8x32xf32, #tpu.memory_space<vmem>>, vector<8x32xf32>
    %c0_16 = arith.constant 0 : index
    %c0_17 = arith.constant 0 : index
    %15 = vector.load %arg2[%c0_16, %c0_17] : memref<8x32xf32, #tpu.memory_space<vmem>>, vector<8x32xf32>
    %c0_18 = arith.constant 0 : index
    %c0_19 = arith.constant 0 : index
    %16 = vector.load %arg9[%c0_18, %c0_19] : memref<64x128xf32, #tpu.memory_space<vmem>>, vector<8x128xf32>
    %cst_20 = arith.constant dense<0.000000e+00> : vector<8x128xf32>
    %17 = tpu.matmul %14, %13, %cst_20 {dimension_numbers = #tpu.dot_dimension_numbers<[1], [0], [0], [1], [0, 0, 1, 1], [], []>} : vector<8x32xf32>, vector<32x128xf32>, vector<8x128xf32> -> vector<8x128xf32>
    %18 = arith.addf %16, %17 : vector<8x128xf32>
    %19 = arith.negf %18 : vector<8x128xf32>
    %20 = math.exp %19 : vector<8x128xf32>
    %cst_21 = arith.constant 1.000000e+00 : f32
    %21 = vector.broadcast %cst_21 : f32 to vector<8x128xf32>
    %22 = arith.addf %21, %20 : vector<8x128xf32>
    %23 = arith.divf %21, %22 : vector<8x128xf32>
    %24 = vector.extract_strided_slice %18 {offsets = [0, 64], sizes = [8, 32], strides = [1, 1]} : vector<8x128xf32> to vector<8x32xf32>
    %25 = math.tanh %24 : vector<8x32xf32>
    %26 = vector.extract_strided_slice %23 {offsets = [0, 0], sizes = [8, 32], strides = [1, 1]} : vector<8x128xf32> to vector<8x32xf32>
    %27 = vector.extract_strided_slice %23 {offsets = [0, 32], sizes = [8, 32], strides = [1, 1]} : vector<8x128xf32> to vector<8x32xf32>
    %28 = vector.extract_strided_slice %23 {offsets = [0, 96], sizes = [8, 32], strides = [1, 1]} : vector<8x128xf32> to vector<8x32xf32>
    %29 = arith.mulf %27, %15 : vector<8x32xf32>
    %30 = arith.mulf %26, %25 : vector<8x32xf32>
    %31 = arith.addf %29, %30 : vector<8x32xf32>
    %32 = math.tanh %31 : vector<8x32xf32>
    %33 = arith.mulf %28, %32 : vector<8x32xf32>
    %c8 = arith.constant 8 : index
    %c0_22 = arith.constant 0 : index
    %34 = vector.load %arg9[%c8, %c0_22] : memref<64x128xf32, #tpu.memory_space<vmem>>, vector<8x128xf32>
    %cst_23 = arith.constant dense<0.000000e+00> : vector<8x128xf32>
    %35 = tpu.matmul %33, %13, %cst_23 {dimension_numbers = #tpu.dot_dimension_numbers<[1], [0], [0], [1], [0, 0, 1, 1], [], []>} : vector<8x32xf32>, vector<32x128xf32>, vector<8x128xf32> -> vector<8x128xf32>
    %36 = arith.addf %34, %35 : vector<8x128xf32>
    %37 = arith.negf %36 : vector<8x128xf32>
    %38 = math.exp %37 : vector<8x128xf32>
    %cst_24 = arith.constant 1.000000e+00 : f32
    %39 = vector.broadcast %cst_24 : f32 to vector<8x128xf32>
    %40 = arith.addf %39, %38 : vector<8x128xf32>
    %41 = arith.divf %39, %40 : vector<8x128xf32>
    %42 = vector.extract_strided_slice %36 {offsets = [0, 64], sizes = [8, 32], strides = [1, 1]} : vector<8x128xf32> to vector<8x32xf32>
    %43 = math.tanh %42 : vector<8x32xf32>
    %44 = vector.extract_strided_slice %41 {offsets = [0, 0], sizes = [8, 32], strides = [1, 1]} : vector<8x128xf32> to vector<8x32xf32>
    %45 = vector.extract_strided_slice %41 {offsets = [0, 32], sizes = [8, 32], strides = [1, 1]} : vector<8x128xf32> to vector<8x32xf32>
    %46 = vector.extract_strided_slice %41 {offsets = [0, 96], sizes = [8, 32], strides = [1, 1]} : vector<8x128xf32> to vector<8x32xf32>
    %47 = arith.mulf %45, %31 : vector<8x32xf32>
    %48 = arith.mulf %44, %43 : vector<8x32xf32>
    %49 = arith.addf %47, %48 : vector<8x32xf32>
    %50 = math.tanh %49 : vector<8x32xf32>
    %51 = arith.mulf %46, %50 : vector<8x32xf32>
    %c16 = arith.constant 16 : index
    %c0_25 = arith.constant 0 : index
    %52 = vector.load %arg9[%c16, %c0_25] : memref<64x128xf32, #tpu.memory_space<vmem>>, vector<8x128xf32>
    %cst_26 = arith.constant dense<0.000000e+00> : vector<8x128xf32>
    %53 = tpu.matmul %51, %13, %cst_26 {dimension_numbers = #tpu.dot_dimension_numbers<[1], [0], [0], [1], [0, 0, 1, 1], [], []>} : vector<8x32xf32>, vector<32x128xf32>, vector<8x128xf32> -> vector<8x128xf32>
    %54 = arith.addf %52, %53 : vector<8x128xf32>
    %55 = arith.negf %54 : vector<8x128xf32>
    %56 = math.exp %55 : vector<8x128xf32>
    %cst_27 = arith.constant 1.000000e+00 : f32
    %57 = vector.broadcast %cst_27 : f32 to vector<8x128xf32>
    %58 = arith.addf %57, %56 : vector<8x128xf32>
    %59 = arith.divf %57, %58 : vector<8x128xf32>
    %60 = vector.extract_strided_slice %54 {offsets = [0, 64], sizes = [8, 32], strides = [1, 1]} : vector<8x128xf32> to vector<8x32xf32>
    %61 = math.tanh %60 : vector<8x32xf32>
    %62 = vector.extract_strided_slice %59 {offsets = [0, 0], sizes = [8, 32], strides = [1, 1]} : vector<8x128xf32> to vector<8x32xf32>
    %63 = vector.extract_strided_slice %59 {offsets = [0, 32], sizes = [8, 32], strides = [1, 1]} : vector<8x128xf32> to vector<8x32xf32>
    %64 = vector.extract_strided_slice %59 {offsets = [0, 96], sizes = [8, 32], strides = [1, 1]} : vector<8x128xf32> to vector<8x32xf32>
    %65 = arith.mulf %63, %49 : vector<8x32xf32>
    %66 = arith.mulf %62, %61 : vector<8x32xf32>
    %67 = arith.addf %65, %66 : vector<8x32xf32>
    %68 = math.tanh %67 : vector<8x32xf32>
    %69 = arith.mulf %64, %68 : vector<8x32xf32>
    %c24 = arith.constant 24 : index
    %c0_28 = arith.constant 0 : index
    %70 = vector.load %arg9[%c24, %c0_28] : memref<64x128xf32, #tpu.memory_space<vmem>>, vector<8x128xf32>
    %cst_29 = arith.constant dense<0.000000e+00> : vector<8x128xf32>
    %71 = tpu.matmul %69, %13, %cst_29 {dimension_numbers = #tpu.dot_dimension_numbers<[1], [0], [0], [1], [0, 0, 1, 1], [], []>} : vector<8x32xf32>, vector<32x128xf32>, vector<8x128xf32> -> vector<8x128xf32>
    %72 = arith.addf %70, %71 : vector<8x128xf32>
    %73 = arith.negf %72 : vector<8x128xf32>
    %74 = math.exp %73 : vector<8x128xf32>
    %cst_30 = arith.constant 1.000000e+00 : f32
    %75 = vector.broadcast %cst_30 : f32 to vector<8x128xf32>
    %76 = arith.addf %75, %74 : vector<8x128xf32>
    %77 = arith.divf %75, %76 : vector<8x128xf32>
    %78 = vector.extract_strided_slice %72 {offsets = [0, 64], sizes = [8, 32], strides = [1, 1]} : vector<8x128xf32> to vector<8x32xf32>
    %79 = math.tanh %78 : vector<8x32xf32>
    %80 = vector.extract_strided_slice %77 {offsets = [0, 0], sizes = [8, 32], strides = [1, 1]} : vector<8x128xf32> to vector<8x32xf32>
    %81 = vector.extract_strided_slice %77 {offsets = [0, 32], sizes = [8, 32], strides = [1, 1]} : vector<8x128xf32> to vector<8x32xf32>
    %82 = vector.extract_strided_slice %77 {offsets = [0, 96], sizes = [8, 32], strides = [1, 1]} : vector<8x128xf32> to vector<8x32xf32>
    %83 = arith.mulf %81, %67 : vector<8x32xf32>
    %84 = arith.mulf %80, %79 : vector<8x32xf32>
    %85 = arith.addf %83, %84 : vector<8x32xf32>
    %86 = math.tanh %85 : vector<8x32xf32>
    %87 = arith.mulf %82, %86 : vector<8x32xf32>
    %c32 = arith.constant 32 : index
    %c0_31 = arith.constant 0 : index
    %88 = vector.load %arg9[%c32, %c0_31] : memref<64x128xf32, #tpu.memory_space<vmem>>, vector<8x128xf32>
    %cst_32 = arith.constant dense<0.000000e+00> : vector<8x128xf32>
    %89 = tpu.matmul %87, %13, %cst_32 {dimension_numbers = #tpu.dot_dimension_numbers<[1], [0], [0], [1], [0, 0, 1, 1], [], []>} : vector<8x32xf32>, vector<32x128xf32>, vector<8x128xf32> -> vector<8x128xf32>
    %90 = arith.addf %88, %89 : vector<8x128xf32>
    %91 = arith.negf %90 : vector<8x128xf32>
    %92 = math.exp %91 : vector<8x128xf32>
    %cst_33 = arith.constant 1.000000e+00 : f32
    %93 = vector.broadcast %cst_33 : f32 to vector<8x128xf32>
    %94 = arith.addf %93, %92 : vector<8x128xf32>
    %95 = arith.divf %93, %94 : vector<8x128xf32>
    %96 = vector.extract_strided_slice %90 {offsets = [0, 64], sizes = [8, 32], strides = [1, 1]} : vector<8x128xf32> to vector<8x32xf32>
    %97 = math.tanh %96 : vector<8x32xf32>
    %98 = vector.extract_strided_slice %95 {offsets = [0, 0], sizes = [8, 32], strides = [1, 1]} : vector<8x128xf32> to vector<8x32xf32>
    %99 = vector.extract_strided_slice %95 {offsets = [0, 32], sizes = [8, 32], strides = [1, 1]} : vector<8x128xf32> to vector<8x32xf32>
    %100 = vector.extract_strided_slice %95 {offsets = [0, 96], sizes = [8, 32], strides = [1, 1]} : vector<8x128xf32> to vector<8x32xf32>
    %101 = arith.mulf %99, %85 : vector<8x32xf32>
    %102 = arith.mulf %98, %97 : vector<8x32xf32>
    %103 = arith.addf %101, %102 : vector<8x32xf32>
    %104 = math.tanh %103 : vector<8x32xf32>
    %105 = arith.mulf %100, %104 : vector<8x32xf32>
    %c40 = arith.constant 40 : index
    %c0_34 = arith.constant 0 : index
    %106 = vector.load %arg9[%c40, %c0_34] : memref<64x128xf32, #tpu.memory_space<vmem>>, vector<8x128xf32>
    %cst_35 = arith.constant dense<0.000000e+00> : vector<8x128xf32>
    %107 = tpu.matmul %105, %13, %cst_35 {dimension_numbers = #tpu.dot_dimension_numbers<[1], [0], [0], [1], [0, 0, 1, 1], [], []>} : vector<8x32xf32>, vector<32x128xf32>, vector<8x128xf32> -> vector<8x128xf32>
    %108 = arith.addf %106, %107 : vector<8x128xf32>
    %109 = arith.negf %108 : vector<8x128xf32>
    %110 = math.exp %109 : vector<8x128xf32>
    %cst_36 = arith.constant 1.000000e+00 : f32
    %111 = vector.broadcast %cst_36 : f32 to vector<8x128xf32>
    %112 = arith.addf %111, %110 : vector<8x128xf32>
    %113 = arith.divf %111, %112 : vector<8x128xf32>
    %114 = vector.extract_strided_slice %108 {offsets = [0, 64], sizes = [8, 32], strides = [1, 1]} : vector<8x128xf32> to vector<8x32xf32>
    %115 = math.tanh %114 : vector<8x32xf32>
    %116 = vector.extract_strided_slice %113 {offsets = [0, 0], sizes = [8, 32], strides = [1, 1]} : vector<8x128xf32> to vector<8x32xf32>
    %117 = vector.extract_strided_slice %113 {offsets = [0, 32], sizes = [8, 32], strides = [1, 1]} : vector<8x128xf32> to vector<8x32xf32>
    %118 = vector.extract_strided_slice %113 {offsets = [0, 96], sizes = [8, 32], strides = [1, 1]} : vector<8x128xf32> to vector<8x32xf32>
    %119 = arith.mulf %117, %103 : vector<8x32xf32>
    %120 = arith.mulf %116, %115 : vector<8x32xf32>
    %121 = arith.addf %119, %120 : vector<8x32xf32>
    %122 = math.tanh %121 : vector<8x32xf32>
    %123 = arith.mulf %118, %122 : vector<8x32xf32>
    %c48 = arith.constant 48 : index
    %c0_37 = arith.constant 0 : index
    %124 = vector.load %arg9[%c48, %c0_37] : memref<64x128xf32, #tpu.memory_space<vmem>>, vector<8x128xf32>
    %cst_38 = arith.constant dense<0.000000e+00> : vector<8x128xf32>
    %125 = tpu.matmul %123, %13, %cst_38 {dimension_numbers = #tpu.dot_dimension_numbers<[1], [0], [0], [1], [0, 0, 1, 1], [], []>} : vector<8x32xf32>, vector<32x128xf32>, vector<8x128xf32> -> vector<8x128xf32>
    %126 = arith.addf %124, %125 : vector<8x128xf32>
    %127 = arith.negf %126 : vector<8x128xf32>
    %128 = math.exp %127 : vector<8x128xf32>
    %cst_39 = arith.constant 1.000000e+00 : f32
    %129 = vector.broadcast %cst_39 : f32 to vector<8x128xf32>
    %130 = arith.addf %129, %128 : vector<8x128xf32>
    %131 = arith.divf %129, %130 : vector<8x128xf32>
    %132 = vector.extract_strided_slice %126 {offsets = [0, 64], sizes = [8, 32], strides = [1, 1]} : vector<8x128xf32> to vector<8x32xf32>
    %133 = math.tanh %132 : vector<8x32xf32>
    %134 = vector.extract_strided_slice %131 {offsets = [0, 0], sizes = [8, 32], strides = [1, 1]} : vector<8x128xf32> to vector<8x32xf32>
    %135 = vector.extract_strided_slice %131 {offsets = [0, 32], sizes = [8, 32], strides = [1, 1]} : vector<8x128xf32> to vector<8x32xf32>
    %136 = vector.extract_strided_slice %131 {offsets = [0, 96], sizes = [8, 32], strides = [1, 1]} : vector<8x128xf32> to vector<8x32xf32>
    %137 = arith.mulf %135, %121 : vector<8x32xf32>
    %138 = arith.mulf %134, %133 : vector<8x32xf32>
    %139 = arith.addf %137, %138 : vector<8x32xf32>
    %140 = math.tanh %139 : vector<8x32xf32>
    %141 = arith.mulf %136, %140 : vector<8x32xf32>
    %c56 = arith.constant 56 : index
    %c0_40 = arith.constant 0 : index
    %142 = vector.load %arg9[%c56, %c0_40] : memref<64x128xf32, #tpu.memory_space<vmem>>, vector<8x128xf32>
    %cst_41 = arith.constant dense<0.000000e+00> : vector<8x128xf32>
    %143 = tpu.matmul %141, %13, %cst_41 {dimension_numbers = #tpu.dot_dimension_numbers<[1], [0], [0], [1], [0, 0, 1, 1], [], []>} : vector<8x32xf32>, vector<32x128xf32>, vector<8x128xf32> -> vector<8x128xf32>
    %144 = arith.addf %142, %143 : vector<8x128xf32>
    %145 = arith.negf %144 : vector<8x128xf32>
    %146 = math.exp %145 : vector<8x128xf32>
    %cst_42 = arith.constant 1.000000e+00 : f32
    %147 = vector.broadcast %cst_42 : f32 to vector<8x128xf32>
    %148 = arith.addf %147, %146 : vector<8x128xf32>
    %149 = arith.divf %147, %148 : vector<8x128xf32>
    %150 = vector.extract_strided_slice %144 {offsets = [0, 64], sizes = [8, 32], strides = [1, 1]} : vector<8x128xf32> to vector<8x32xf32>
    %151 = math.tanh %150 : vector<8x32xf32>
    %152 = vector.extract_strided_slice %149 {offsets = [0, 0], sizes = [8, 32], strides = [1, 1]} : vector<8x128xf32> to vector<8x32xf32>
    %153 = vector.extract_strided_slice %149 {offsets = [0, 32], sizes = [8, 32], strides = [1, 1]} : vector<8x128xf32> to vector<8x32xf32>
    %154 = vector.extract_strided_slice %149 {offsets = [0, 96], sizes = [8, 32], strides = [1, 1]} : vector<8x128xf32> to vector<8x32xf32>
    %155 = arith.mulf %153, %139 : vector<8x32xf32>
    %156 = arith.mulf %152, %151 : vector<8x32xf32>
    %157 = arith.addf %155, %156 : vector<8x32xf32>
    %158 = math.tanh %157 : vector<8x32xf32>
    %159 = arith.mulf %154, %158 : vector<8x32xf32>
    %c0_43 = arith.constant 0 : index
    %c0_44 = arith.constant 0 : index
    %160 = vector.load %arg8[%c0_43, %c0_44] : memref<8x32xf32, #tpu.memory_space<vmem>>, vector<8x32xf32>
    tpu.vector_store %arg8[%c0_43, %c0_44], %159 {strides = array<i32>} : memref<8x32xf32, #tpu.memory_space<vmem>>, vector<8x32xf32>,
    return
  }
}

</mosaic_0001>

<bundles_post_ra>
// kernel: tpu_custom_call.1
= control target key start
LH: loop header
LB: loop body
LE: loop exit
PB: predicated region body
PF: predicated region fallthrough
CT: control target
= control target key end

     0   :  { %13 = vsyncpa [#allocation4], 0  ;;  %s1922_s0 = inlined_call_operand.vmem [shape: f32[64,16], index: 0, kind: input, shape index: {}]   ;;  %s1923_s1 = inlined_call_operand.hbm [shape: f32[8,32], index: 1, kind: input, shape index: {}]   ;;  %s1924_s2 = inlined_call_operand.hbm [shape: f32[8,32], index: 2, kind: input, shape index: {}]   ;;  %s1925_s3 = inlined_call_operand.vmem [shape: f32[16,32], index: 3, kind: input, shape index: {}]   ;;  %s1926_s4 = inlined_call_operand.vmem [shape: f32[1,32], index: 4, kind: input, shape index: {}]   ;;  %s1927_s5 = inlined_call_operand.vmem [shape: f32[32,128], index: 5, kind: input, shape index: {}]   ;;  %s1928_s6 = inlined_call_operand.vmem [shape: f32[1,128], index: 6, kind: input, shape index: {}]   ;;  %s1929_s7 = inlined_call_operand.vmem [shape: f32[32,128], index: 7, kind: input, shape index: {}]   ;;  %s1930_s8 = inlined_call_operand.hbm [shape: f32[8,32], index: 8, kind: output, shape index: {}]  }
   0x1   :  { %14 = vsyncpa [#allocation7], 0 }
   0x2   :  { %15 = vsyncpa [#allocation5], 0  ;;  %s1635_s27 = smov [#allocation3]   ;;  %s1636_s29 = smov [#allocation6]  }
   0x3   :  { %s24_s28 = sshll.u32 %s1635_s27, 4  ;;  %s34_s30 = sshll.u32 %s1636_s29, 4  ;;  %s25_s28 = int_to_ptr.vmem [resolvable:$true] %s24_s28  ;;  %s35_s30 = int_to_ptr.vmem [resolvable:$true] %s34_s30 }
   0x4   :  { %s1563_s11 = scalar_lea.hbm %s1923_s1, 128 }
   0x5   :  { %p1564_p0 = scmp.ne.s32.totalorder %s1923_s1, %s1563_s11  ;;  %p1567_p1 = scmp.lt.u32.totalorder %s1563_s11, %s1923_s1 }
   0x7   :  { %p1569_p2 = pnand %p1567_p1, %p1564_p0 }
   0x9   :  { %1572 = shalt.err (!%p1569_p2)
}
   0xa   :  { %s1573_s16 = scalar_lea.vmem %s25_s28, 128  ;;  %p1578_p4 = scmp.lt.s32.totalorder %s25_s28, %s25_s28 }
   0xb   :  { %p1574_p3 = scmp.ne.s32.totalorder %s25_s28, %s1573_s16  ;;  %p1579_p5 = scmp.lt.s32.totalorder %s1573_s16, %s1573_s16 }
   0xd   :  { %p1580_p6 = por %p1579_p5, %p1578_p4 }
   0xf   :  { %p1581_p7 = pnand %p1580_p6, %p1574_p3 }
  0x11   :  { %1584 = shalt.err (!%p1581_p7)
}
  0x12   :  { %27 = dma.hbm_to_vmem [thread:$0]  %s1923_s1, 128, %s25_s28, [#allocation4]  }
  0x13   :  { %s1585_s21 = scalar_lea.hbm %s1924_s2, 128 }
  0x14   :  { %p1586_p8 = scmp.ne.s32.totalorder %s1924_s2, %s1585_s21  ;;  %p1589_p9 = scmp.lt.u32.totalorder %s1585_s21, %s1924_s2 }
  0x16   :  { %p1591_p10 = pnand %p1589_p9, %p1586_p8 }
  0x18   :  { %1594 = shalt.err (!%p1591_p10)
}
  0x19   :  { %s1595_s26 = scalar_lea.vmem %s35_s30, 128  ;;  %p1600_p12 = scmp.lt.s32.totalorder %s35_s30, %s35_s30 }
  0x1a   :  { %p1596_p11 = scmp.ne.s32.totalorder %s35_s30, %s1595_s26  ;;  %p1601_p13 = scmp.lt.s32.totalorder %s1595_s26, %s1595_s26 }
  0x1c   :  { %p1602_p0 = por %p1601_p13, %p1600_p12 }
  0x1e   :  { %p1603_p1 = pnand %p1602_p0, %p1596_p11 }
  0x20   :  { %1606 = shalt.err (!%p1603_p1)
}
  0x21   :  { %37 = dma.hbm_to_vmem [thread:$0]  %s1924_s2, 128, %s35_s30, [#allocation7]  }
  0x22   :  { %1629 = dma.done.wait [#allocation4], 128  }
  0x23   :  { %1630 = vsyncadd [#allocation4], 4294967168 }
  0x24   :  { %1631 = dma.done.wait [#allocation7], 128  }
  0x25   :  { %1632 = vsyncadd [#allocation7], 4294967168  ;;  %vm71_vm0 = vcmask 130048   ;;  %v62_v0 = vld [vmem:[%s1925_s3] sm:$0xff]  ;;  %v63_v1 = vld [vmem:[%s1925_s3 + $0x8] sm:$0xff]  ;;  %v1637_v10 = vmov 0.0|0.0  }
  0x26   :  { %v54_v2 = vld [vmem:[%s1922_s0] sm:$0xff]  ;;  %v1415_v3 = vpack.c.bf16 %v63_v1, %v62_v0  ;;  %v55_v4 = vld [vmem:[%s1922_s0 + $0x8] sm:$0xff]  ;;  %v56_v5 = vld [vmem:[%s1922_s0 + $0x10] sm:$0xff]  ;;  %vm220_vm1 = vcmask 261120   ;;  %vm1638_vm2 = vmmov 0   ;;  %v1639_v25 = vmov 0.0  }
  0x27   :  { %1295 = vmatprep.mubr.msk.f32.mxu0 %vm71_vm0, %v54_v2  ;;  %v57_v6 = vld [vmem:[%s1922_s0 + $0x18] sm:$0xff]  ;;  %v358_v7 = vld [vmem:[%s1929_s7] sm:$0xff]  ;;  %v359_v8 = vld [vmem:[%s1929_s7 + $0x8] sm:$0xff]  ;;  %s1640_s15 = smov 64   ;;  %s1641_s16 = smov 32  }
  0x28   :  { %1416 = vmatprep.subr.bf16.mxu0 %v1415_v3  ;;  %v58_v9 = vld [vmem:[%s1922_s0 + $0x20] sm:$0xff]  ;;  %v1744_v11 = vpack.c.bf16 %v359_v8, %v358_v7  ;;  %v59_v12 = vld [vmem:[%s1922_s0 + $0x28] sm:$0xff]  ;;  %v360_v16 = vld [vmem:[%s1929_s7 + $0x10] sm:$0xff] }
  0x29   :  { %1418 = vmatpush3.bf16.msra.mxu0 %v1415_v3  ;;  %v209_v13 = vld [vmem:[%s1927_s5] sm:$0xff]  ;;  %v210_v14 = vld [vmem:[%s1927_s5 + $0x8] sm:$0xff]  ;;  %v361_v17 = vld [vmem:[%s1929_s7 + $0x18] sm:$0xff] }
  0x2a   :  { %1427 = vmatprep.subr.bf16.mxu0 %v1637_v10  ;;  %v1419_v15 = vpack.c.bf16 %v210_v14, %v209_v13  ;;  %v60_v18 = vld [vmem:[%s1922_s0 + $0x30] sm:$0xff]  ;;  %v1766_v19 = vpack.c.bf16 %v361_v17, %v360_v16  ;;  %v212_v21 = vld [vmem:[%s1927_s5 + $0x18] sm:$0xff]  ;;  %v362_v24 = vld [vmem:[#allocation3] sm:$0xff] }
  0x2b   :  { %v211_v20 = vld [vmem:[%s1927_s5 + $0x10] sm:$0xff]  ;;  %v61_v23 = vld [vmem:[%s1922_s0 + $0x38] sm:$0xff]  ;;  %v1195_v26 = vld [vmem:[%s1926_s4] ss:$0 sm:$0xff] }
  0x2c   :  { %1296 = vmatmul.mubr.msk.f32.vlgmr.msra.gmra.mrb[0].mxu0 %vm71_vm0, %v55_v4  ;;  %1420 = vmatprep.subr.bf16.mxu1 %v1419_v15  ;;  %v1423_v22 = vpack.c.bf16 %v212_v21, %v211_v20  ;;  %v1813_v53 = vld [vmem:[%s1928_s6] ss:$0 sm:$0xff]  ;;  %v363_v59 = vld [vmem:[#allocation6] sm:$0xff]  ;;  %s1642_s6 = smov [#allocation8]  }
  0x2d   :  { %1298 = vmatprep.mubr.msk.f32.mxu0 %vm71_vm0, %v56_v5  ;;  %1429 = vmatpush3.bf16.msra.mxu0 %v1744_v11  ;;  %s1185_s17 = sshll.u32 %s1642_s6, 4  ;;  %s1186_s17 = int_to_ptr.vmem [resolvable:$true] %s1185_s17 }
  0x2e   :  { %1422 = vmatpush3.bf16.msra.mxu1 %v1419_v15  ;;  %1430 = vmatprep.subr.bf16.mxu0 %v1637_v10  ;;  %s1607_s18 = scalar_lea.vmem %s1186_s17, 128  ;;  %p1612_p3 = scmp.lt.s32.totalorder %s1186_s17, %s1186_s17 }
  0x2f   :  { %1424 = vmatprep.subr.bf16.mxu1 %v1423_v22  ;;  %p1608_p2 = scmp.ne.s32.totalorder %s1186_s17, %s1607_s18  ;;  %p1613_p4 = scmp.lt.s32.totalorder %s1607_s18, %s1607_s18 }
  0x30   :  { %1299 = vmatmul.mubr.msk.f32.gmra.mrb[2].mxu0 %vm71_vm0, %v57_v6 }
  0x31   :  { %1301 = vmatprep.mubr.msk.f32.mxu0 %vm71_vm0, %v58_v9  ;;  %1432 = vmatpush3.bf16.msra.mxu0 %v1766_v19  ;;  %p1614_p5 = por %p1613_p4, %p1612_p3 }
  0x32   :  { %1439 = vmatprep.subr.bf16.mxu0 %v1637_v10  ;;  %1426 = vmatpush3.bf16.msra.mxu1 %v1423_v22 }
  0x33   :  { %1433 = vmatprep.subr.bf16.mxu1 %v1637_v10  ;;  %p1615_p6 = pnand %p1614_p5, %p1608_p2 }
  0x34   :  { %1302 = vmatmul.mubr.msk.f32.gmra.mrb[4].mxu0 %vm71_vm0, %v59_v12 }
  0x35   :  { %1304 = vmatprep.mubr.msk.f32.mxu0 %vm71_vm0, %v60_v18 }
  0x38   :  { %1305 = vmatmul.mubr.msk.f32.gmra.mrb[6].mxu0 %vm71_vm0, %v61_v23 }
  0x39   :  { %1335 = vmatprep.mubr.msk.f32.mxu0 %vm1638_vm2, %v1639_v25 }
  0x3c   :  { %1336 = vmatmul.mubr.msk.f32.vlgmr.msra.gmra.mrb[8].mxu0 %vm220_vm1, %v362_v24 }
  0x3d   :  { %1441 = vmatpush3.bf16.msra.mxu0 %v1744_v11  ;;  %1357 = vmatprep.mubr.msk.f32.mxu0 %vm1638_vm2, %v1639_v25 }
  0x3e   :  { %1442 = vmatprep.subr.bf16.mxu0 %v1637_v10 }
  0x41   :  { %1444 = vmatpush3.bf16.msra.mxu0 %v1766_v19 }
  0x42   :  { %1451 = vmatprep.subr.bf16.mxu0 %v1637_v10 }
  0xff   :  { %v1297_v27 = vpop.f32.mrb[0].mxu0 }
 0x100   :  { %v168_v28 = vadd.f32 %v1297_v27, %v1195_v26  ;;  %v162_v29 = vpop.f32.mrb[1].mxu0 }
 0x101   :  { %v163_v30 = vadd.f32 %v1195_v26, %v162_v29 }
 0x103   :  { %1483 = vtanh.f32 %v163_v30  ;;  %v1300_v33 = vpop.f32.mrb[2].mxu0 }
 0x104   :  { %1485 = vtanh.f32 %v168_v28  ;;  %v178_v34 = vadd.f32 %v1300_v33, %v1195_v26  ;;  %v172_v35 = vpop.f32.mrb[3].mxu0 }
 0x105   :  { %v173_v36 = vadd.f32 %v1195_v26, %v172_v35 }
 0x106   :  { %1487 = vtanh.f32 %v178_v34 }
 0x107   :  { %1489 = vtanh.f32 %v173_v36  ;;  %v1303_v37 = vpop.f32.mrb[4].mxu0 }
 0x108   :  { %v188_v38 = vadd.f32 %v1303_v37, %v1195_v26  ;;  %v182_v39 = vpop.f32.mrb[5].mxu0 }
 0x109   :  { %v183_v40 = vadd.f32 %v1195_v26, %v182_v39 }
 0x10a   :  { %1491 = vtanh.f32 %v188_v38 }
 0x10b   :  { %1493 = vtanh.f32 %v183_v40  ;;  %v1306_v41 = vpop.f32.mrb[6].mxu0 }
 0x10c   :  { %v198_v42 = vadd.f32 %v1306_v41, %v1195_v26  ;;  %v192_v43 = vpop.f32.mrb[7].mxu0 }
 0x10d   :  { %v1484_v31 = vpop.eup %1483  ;;  %v193_v44 = vadd.f32 %v1195_v26, %v192_v43 }
 0x10e   :  { %v1486_v32 = vpop.eup %1485  ;;  %1315 = vmatprep.mubr.msk.f32.mxu1 %vm220_vm1, %v1484_v31  ;;  %1495 = vtanh.f32 %v198_v42 }
 0x10f   :  { %1316 = vmatmul.mubr.msk.f32.vlgmr.msra.gmra.mrb[0].mxu1 %vm220_vm1, %v1486_v32  ;;  %1497 = vtanh.f32 %v193_v44  ;;  %v434_v47 = vpop.f32.mrb[8].mxu0 }
 0x110   :  { %1435 = vmatpush3.bf16.msra.mxu1 %v1744_v11  ;;  %v1488_v45 = vpop.eup %1487  ;;  %v1337_v48 = vpop.f32.mrb[9].mxu0 }
 0x111   :  { %1436 = vmatprep.subr.bf16.mxu1 %v1637_v10  ;;  %v1490_v46 = vpop.eup %1489 }
 0x112   :  { %1318 = vmatprep.mubr.msk.f32.mxu1 %vm220_vm1, %v1490_v46 }
 0x113   :  { %1319 = vmatmul.mubr.msk.f32.gmra.mrb[2].mxu1 %vm220_vm1, %v1488_v45 }
 0x114   :  { %1438 = vmatpush3.bf16.msra.mxu1 %v1766_v19  ;;  %v1492_v49 = vpop.eup %1491 }
 0x115   :  { %1445 = vmatprep.subr.bf16.mxu1 %v1637_v10  ;;  %v1494_v50 = vpop.eup %1493 }
 0x116   :  { %1321 = vmatprep.mubr.msk.f32.mxu1 %vm220_vm1, %v1494_v50 }
 0x117   :  { %1322 = vmatmul.mubr.msk.f32.gmra.mrb[4].mxu1 %vm220_vm1, %v1492_v49 }
 0x118   :  { %v1496_v51 = vpop.eup %1495 }
 0x119   :  { %v1498_v52 = vpop.eup %1497 }
 0x11a   :  { %1324 = vmatprep.mubr.msk.f32.mxu1 %vm220_vm1, %v1498_v52 }
 0x11b   :  { %1325 = vmatmul.mubr.msk.f32.gmra.mrb[6].mxu1 %vm220_vm1, %v1496_v51 }
 0x11c   :  { %1346 = vmatprep.mubr.msk.f32.mxu1 %vm1638_vm2, %v1639_v25 }
 0x1e2   :  { %v1317_v54 = vpop.f32.mrb[0].mxu1 }
 0x1e3   :  { %v311_v55 = vpop.f32.mrb[1].mxu1  ;;  %v317_v18 = vadd.f32 %v1317_v54, %v1813_v53 }
 0x1e4   :  { %v312_v56 = vadd.f32 %v1813_v53, %v311_v55 }
 0x1e6   :  { %v438_v57 = vadd.f32 %v434_v47, %v312_v56  ;;  %v1818_v60 = vpop.f32.mrb[2].mxu1 }
 0x1e7   :  { %v1820_v61 = vpop.f32.mrb[3].mxu1 }
 0x1e8   :  { %1499 = vtanh.f32 %v438_v57  ;;  %v1214_v2 = vmul.f32 -1.442695, %v438_v57  ;;  %v322_v38 = vadd.f32 %v1813_v53, %v1820_v61  ;;  %v327_v57 = vadd.f32 %v1818_v60, %v1813_v53 }
 0x1ea   :  { %v1822_v62 = vpop.f32.mrb[4].mxu1  ;;  %1501 = vpow2.f32 %v1214_v2 }
 0x1eb   :  { %v1824_v63 = vpop.f32.mrb[5].mxu1 }
 0x1ee   :  { %v1826_v0 = vpop.f32.mrb[6].mxu1 }
 0x1ef   :  { %v1828_v1 = vpop.f32.mrb[7].mxu1 }
 0x1f2   :  { %v1500_v58 = vpop.eup %1499 }
 0x1f3   :  { %452 = vrot.lane.b32.xlu0 %v1500_v58, %s1640_s15 }
 0x1f4   :  { %v1502_v3 = vpop.eup %1501 }
 0x1f5   :  { %v442_v4 = vadd.f32 1.0, %v1502_v3 }
 0x1f7   :  { %447 = vrot.lane.b32.xlu0 %v363_v59, %s1641_s16  ;;  %1503 = vrcp.f32 %v442_v4 }
 0x201   :  { %v1504_v5 = vpop.eup %1503 }
 0x265   :  { %v453_v6 = vpop.permute.xlu0 %452 }
 0x266   :  { %v455_v7 = vmul.f32 %v1504_v5, %v453_v6 }
 0x268   :  { %457 = vrot.lane.b32.xlu1 %v455_v7, %s1641_s16 }
 0x269   :  { %v448_v8 = vpop.permute.xlu0 %447 }
 0x26a   :  { %v450_v9 = vmul.f32 %v1504_v5, %v448_v8 }
 0x2da   :  { %v458_v12 = vpop.permute.xlu1 %457 }
 0x2db   :  { %v460_v13 = vadd.f32 %v458_v12, %v450_v9 }
 0x2dd   :  { %1505 = vtanh.f32 %v460_v13 }
 0x2e7   :  { %v1506_v14 = vpop.eup %1505 }
 0x2e8   :  { %463 = vrot.lane.b32.xlu1 %v1506_v14, %s1640_s15 }
 0x35a   :  { %v464_v15 = vpop.permute.xlu1 %463 }
 0x35b   :  { %v466_v16 = vmul.f32 %v1504_v5, %v464_v15 }
 0x35d   :  { %469 = vrot.lane.b32.xlu0 %v466_v16, %s1641_s16 }
 0x3cf   :  { %v470_v17 = vpop.permute.xlu0 %469 }
 0x3d0   :  { %1347 = vmatmul.mubr.msk.f32.vlgmr.msra.gmra.mrb[8].mxu1 %vm220_vm1, %v470_v17  ;;  %v332_v17 = vadd.f32 %v1813_v53, %v1824_v63 }
 0x3d1   :  { %1447 = vmatpush3.bf16.msra.mxu1 %v1744_v11  ;;  %1368 = vmatprep.mubr.msk.f32.mxu1 %vm1638_vm2, %v1639_v25 }
 0x3d2   :  { %1448 = vmatprep.subr.bf16.mxu1 %v1637_v10 }
 0x3d5   :  { %1450 = vmatpush3.bf16.msra.mxu1 %v1766_v19 }
 0x3d6   :  { %1457 = vmatprep.subr.bf16.mxu1 %v1637_v10 }
 0x4a3   :  { %v539_v20 = vpop.f32.mrb[8].mxu1 }
 0x4a4   :  { %v543_v21 = vadd.f32 %v539_v20, %v317_v18  ;;  %v1348_v22 = vpop.f32.mrb[9].mxu1 }
 0x4a6   :  { %1507 = vtanh.f32 %v543_v21  ;;  %v1216_v24 = vmul.f32 -1.442695, %v543_v21 }
 0x4a8   :  { %1509 = vpow2.f32 %v1216_v24 }
 0x4b0   :  { %v1508_v23 = vpop.eup %1507 }
 0x4b1   :  { %553 = vrot.lane.b32.xlu1 %v1508_v23, %s1640_s15 }
 0x4b2   :  { %v1510_v26 = vpop.eup %1509 }
 0x4b3   :  { %v547_v27 = vadd.f32 1.0, %v1510_v26 }
 0x4b5   :  { %1511 = vrcp.f32 %v547_v27 }
 0x4bf   :  { %v1512_v28 = vpop.eup %1511 }
 0x4c0   :  { %v551_v31 = vmul.f32 %v1512_v28, %v460_v13 }
 0x523   :  { %v554_v29 = vpop.permute.xlu1 %553 }
 0x524   :  { %v556_v30 = vmul.f32 %v1512_v28, %v554_v29 }
 0x526   :  { %558 = vrot.lane.b32.xlu0 %v556_v30, %s1641_s16 }
 0x598   :  { %v559_v32 = vpop.permute.xlu0 %558 }
 0x599   :  { %v561_v33 = vadd.f32 %v559_v32, %v551_v31 }
 0x59b   :  { %1513 = vtanh.f32 %v561_v33 }
 0x5a5   :  { %v1514_v34 = vpop.eup %1513 }
 0x5a6   :  { %564 = vrot.lane.b32.xlu1 %v1514_v34, %s1640_s15 }
 0x618   :  { %v565_v35 = vpop.permute.xlu1 %564 }
 0x619   :  { %v567_v36 = vmul.f32 %v1512_v28, %v565_v35 }
 0x61b   :  { %570 = vrot.lane.b32.xlu0 %v567_v36, %s1641_s16  ;;  %v337_v36 = vadd.f32 %v1822_v62, %v1813_v53 }
 0x68d   :  { %v571_v37 = vpop.permute.xlu0 %570 }
 0x68e   :  { %1358 = vmatmul.mubr.msk.f32.vlgmr.msra.gmra.mrb[10].mxu0 %vm220_vm1, %v571_v37 }
 0x68f   :  { %1453 = vmatpush3.bf16.msra.mxu0 %v1744_v11  ;;  %1379 = vmatprep.mubr.msk.f32.mxu0 %vm1638_vm2, %v1639_v25 }
 0x690   :  { %1454 = vmatprep.subr.bf16.mxu0 %v1637_v10 }
 0x693   :  { %1456 = vmatpush3.bf16.msra.mxu0 %v1766_v19 }
 0x694   :  { %1463 = vmatprep.subr.bf16.mxu0 %v1637_v10 }
 0x761   :  { %v640_v39 = vpop.f32.mrb[10].mxu0 }
 0x762   :  { %v644_v40 = vadd.f32 %v640_v39, %v322_v38  ;;  %v1359_v41 = vpop.f32.mrb[11].mxu0 }
 0x764   :  { %1515 = vtanh.f32 %v644_v40  ;;  %v1218_v43 = vmul.f32 -1.442695, %v644_v40 }
 0x766   :  { %1517 = vpow2.f32 %v1218_v43 }
 0x76e   :  { %v1516_v42 = vpop.eup %1515 }
 0x76f   :  { %654 = vrot.lane.b32.xlu1 %v1516_v42, %s1640_s15 }
 0x770   :  { %v1518_v44 = vpop.eup %1517 }
 0x771   :  { %v648_v45 = vadd.f32 1.0, %v1518_v44 }
 0x773   :  { %1519 = vrcp.f32 %v648_v45 }
 0x77d   :  { %v1520_v46 = vpop.eup %1519 }
 0x77e   :  { %v652_v49 = vmul.f32 %v1520_v46, %v561_v33 }
 0x7e1   :  { %v655_v47 = vpop.permute.xlu1 %654 }
 0x7e2   :  { %v657_v48 = vmul.f32 %v1520_v46, %v655_v47 }
 0x7e4   :  { %659 = vrot.lane.b32.xlu0 %v657_v48, %s1641_s16 }
 0x856   :  { %v660_v50 = vpop.permute.xlu0 %659 }
 0x857   :  { %v662_v51 = vadd.f32 %v660_v50, %v652_v49  ;;  %v342_v49 = vadd.f32 %v1813_v53, %v1828_v1 }
 0x859   :  { %1521 = vtanh.f32 %v662_v51 }
 0x863   :  { %v1522_v52 = vpop.eup %1521 }
 0x864   :  { %665 = vrot.lane.b32.xlu1 %v1522_v52, %s1640_s15 }
 0x8d6   :  { %v666_v54 = vpop.permute.xlu1 %665 }
 0x8d7   :  { %v668_v55 = vmul.f32 %v1520_v46, %v666_v54 }
 0x8d9   :  { %671 = vrot.lane.b32.xlu0 %v668_v55, %s1641_s16 }
 0x94b   :  { %v672_v56 = vpop.permute.xlu0 %671 }
 0x94c   :  { %1369 = vmatmul.mubr.msk.f32.vlgmr.msra.gmra.mrb[10].mxu1 %vm220_vm1, %v672_v56 }
 0x94d   :  { %1459 = vmatpush3.bf16.msra.mxu1 %v1744_v11  ;;  %1390 = vmatprep.mubr.msk.f32.mxu1 %vm1638_vm2, %v1639_v25 }
 0x94e   :  { %1460 = vmatprep.subr.bf16.mxu1 %v1637_v10 }
 0x951   :  { %1462 = vmatpush3.bf16.msra.mxu1 %v1766_v19 }
 0x952   :  { %1469 = vmatprep.subr.bf16.mxu1 %v1637_v10 }
 0xa1f   :  { %v741_v58 = vpop.f32.mrb[10].mxu1 }
 0xa20   :  { %v745_v59 = vadd.f32 %v741_v58, %v327_v57  ;;  %v1370_v61 = vpop.f32.mrb[11].mxu1 }
 0xa22   :  { %1523 = vtanh.f32 %v745_v59  ;;  %v1220_v3 = vmul.f32 -1.442695, %v745_v59 }
 0xa24   :  { %1525 = vpow2.f32 %v1220_v3 }
 0xa2c   :  { %v1524_v2 = vpop.eup %1523 }
 0xa2d   :  { %755 = vrot.lane.b32.xlu1 %v1524_v2, %s1640_s15 }
 0xa2e   :  { %v1526_v4 = vpop.eup %1525 }
 0xa2f   :  { %v749_v5 = vadd.f32 1.0, %v1526_v4 }
 0xa31   :  { %1527 = vrcp.f32 %v749_v5 }
 0xa3b   :  { %v1528_v6 = vpop.eup %1527 }
 0xa3c   :  { %v753_v9 = vmul.f32 %v1528_v6, %v662_v51 }
 0xa9f   :  { %v756_v7 = vpop.permute.xlu1 %755 }
 0xaa0   :  { %v758_v8 = vmul.f32 %v1528_v6, %v756_v7 }
 0xaa2   :  { %760 = vrot.lane.b32.xlu0 %v758_v8, %s1641_s16  ;;  %v347_v8 = vadd.f32 %v1826_v0, %v1813_v53 }
 0xb14   :  { %v761_v12 = vpop.permute.xlu0 %760 }
 0xb15   :  { %v763_v60 = vadd.f32 %v761_v12, %v753_v9 }
 0xb17   :  { %1529 = vtanh.f32 %v763_v60 }
 0xb21   :  { %v1530_v13 = vpop.eup %1529 }
 0xb22   :  { %766 = vrot.lane.b32.xlu1 %v1530_v13, %s1640_s15 }
 0xb94   :  { %v767_v14 = vpop.permute.xlu1 %766 }
 0xb95   :  { %v769_v15 = vmul.f32 %v1528_v6, %v767_v14 }
 0xb97   :  { %772 = vrot.lane.b32.xlu0 %v769_v15, %s1641_s16 }
 0xc09   :  { %v773_v16 = vpop.permute.xlu0 %772 }
 0xc0a   :  { %1380 = vmatmul.mubr.msk.f32.vlgmr.msra.gmra.mrb[12].mxu0 %vm220_vm1, %v773_v16 }
 0xc0b   :  { %1465 = vmatpush3.bf16.msra.mxu0 %v1744_v11  ;;  %1401 = vmatprep.mubr.msk.f32.mxu0 %vm1638_vm2, %v1639_v25 }
 0xc0c   :  { %1466 = vmatprep.subr.bf16.mxu0 %v1637_v10 }
 0xc0f   :  { %1468 = vmatpush3.bf16.msra.mxu0 %v1766_v19 }
 0xcdd   :  { %v842_v18 = vpop.f32.mrb[12].mxu0 }
 0xcde   :  { %v846_v20 = vadd.f32 %v842_v18, %v332_v17  ;;  %v1381_v21 = vpop.f32.mrb[13].mxu0 }
 0xce0   :  { %1531 = vtanh.f32 %v846_v20  ;;  %v1222_v23 = vmul.f32 -1.442695, %v846_v20 }
 0xce2   :  { %1533 = vpow2.f32 %v1222_v23 }
 0xcea   :  { %v1532_v22 = vpop.eup %1531 }
 0xceb   :  { %856 = vrot.lane.b32.xlu1 %v1532_v22, %s1640_s15 }
 0xcec   :  { %v1534_v24 = vpop.eup %1533 }
 0xced   :  { %v850_v26 = vadd.f32 1.0, %v1534_v24 }
 0xcef   :  { %1535 = vrcp.f32 %v850_v26 }
 0xcf9   :  { %v1536_v27 = vpop.eup %1535 }
 0xcfa   :  { %v854_v30 = vmul.f32 %v1536_v27, %v763_v60 }
 0xd5d   :  { %v857_v28 = vpop.permute.xlu1 %856 }
 0xd5e   :  { %v859_v29 = vmul.f32 %v1536_v27, %v857_v28 }
 0xd60   :  { %861 = vrot.lane.b32.xlu0 %v859_v29, %s1641_s16 }
 0xdd2   :  { %v862_v31 = vpop.permute.xlu0 %861 }
 0xdd3   :  { %v864_v63 = vadd.f32 %v862_v31, %v854_v30 }
 0xdd5   :  { %1537 = vtanh.f32 %v864_v63 }
 0xddf   :  { %v1538_v32 = vpop.eup %1537 }
 0xde0   :  { %867 = vrot.lane.b32.xlu1 %v1538_v32, %s1640_s15 }
 0xe52   :  { %v868_v33 = vpop.permute.xlu1 %867 }
 0xe53   :  { %v870_v34 = vmul.f32 %v1536_v27, %v868_v33 }
 0xe55   :  { %873 = vrot.lane.b32.xlu0 %v870_v34, %s1641_s16 }
 0xec7   :  { %v874_v35 = vpop.permute.xlu0 %873 }
 0xec8   :  { %1391 = vmatmul.mubr.msk.f32.vlgmr.msra.gmra.mrb[12].mxu1 %vm220_vm1, %v874_v35 }
 0xec9   :  { %1471 = vmatpush3.bf16.msra.mxu1 %v1744_v11  ;;  %1412 = vmatprep.mubr.msk.f32.mxu1 %vm1638_vm2, %v1639_v25 }
 0xeca   :  { %1472 = vmatprep.subr.bf16.mxu1 %v1637_v10 }
 0xecd   :  { %1474 = vmatpush3.bf16.msra.mxu1 %v1766_v19 }
 0xf9b   :  { %v943_v37 = vpop.f32.mrb[12].mxu1 }
 0xf9c   :  { %v947_v38 = vadd.f32 %v943_v37, %v337_v36  ;;  %v1392_v39 = vpop.f32.mrb[13].mxu1 }
 0xf9e   :  { %1539 = vtanh.f32 %v947_v38  ;;  %v1224_v41 = vmul.f32 -1.442695, %v947_v38 }
 0xfa0   :  { %1541 = vpow2.f32 %v1224_v41 }
 0xfa8   :  { %v1540_v40 = vpop.eup %1539 }
 0xfa9   :  { %957 = vrot.lane.b32.xlu1 %v1540_v40, %s1640_s15 }
 0xfaa   :  { %v1542_v11 = vpop.eup %1541 }
 0xfab   :  { %v951_v42 = vadd.f32 1.0, %v1542_v11 }
 0xfad   :  { %1543 = vrcp.f32 %v951_v42 }
 0xfb7   :  { %v1544_v25 = vpop.eup %1543 }
 0xfb8   :  { %v955_v19 = vmul.f32 %v1544_v25, %v864_v63 }
0x101b   :  { %v958_v43 = vpop.permute.xlu1 %957 }
0x101c   :  { %v960_v10 = vmul.f32 %v1544_v25, %v958_v43 }
0x101e   :  { %962 = vrot.lane.b32.xlu0 %v960_v10, %s1641_s16 }
0x1090   :  { %v963_v44 = vpop.permute.xlu0 %962 }
0x1091   :  { %v965_v62 = vadd.f32 %v963_v44, %v955_v19 }
0x1093   :  { %1545 = vtanh.f32 %v965_v62 }
0x109d   :  { %v1546_v45 = vpop.eup %1545 }
0x109e   :  { %968 = vrot.lane.b32.xlu1 %v1546_v45, %s1640_s15 }
0x1110   :  { %v969_v46 = vpop.permute.xlu1 %968 }
0x1111   :  { %v971_v47 = vmul.f32 %v1544_v25, %v969_v46 }
0x1113   :  { %974 = vrot.lane.b32.xlu0 %v971_v47, %s1641_s16 }
0x1185   :  { %v975_v48 = vpop.permute.xlu0 %974 }
0x1186   :  { %1402 = vmatmul.mubr.msk.f32.vlgmr.msra.gmra.mrb[14].mxu0 %vm220_vm1, %v975_v48 }
0x1259   :  { %v1044_v50 = vpop.f32.mrb[14].mxu0 }
0x125a   :  { %v1048_v51 = vadd.f32 %v1044_v50, %v342_v49  ;;  %v1403_v52 = vpop.f32.mrb[15].mxu0 }
0x125c   :  { %1547 = vtanh.f32 %v1048_v51  ;;  %v1226_v55 = vmul.f32 -1.442695, %v1048_v51 }
0x125e   :  { %1549 = vpow2.f32 %v1226_v55 }
0x1266   :  { %v1548_v54 = vpop.eup %1547 }
0x1267   :  { %1058 = vrot.lane.b32.xlu1 %v1548_v54, %s1640_s15 }
0x1268   :  { %v1550_v56 = vpop.eup %1549 }
0x1269   :  { %v1052_v57 = vadd.f32 1.0, %v1550_v56 }
0x126b   :  { %1551 = vrcp.f32 %v1052_v57 }
0x1275   :  { %v1552_v58 = vpop.eup %1551 }
0x1276   :  { %v1056_v2 = vmul.f32 %v1552_v58, %v965_v62 }
0x12d9   :  { %v1059_v59 = vpop.permute.xlu1 %1058 }
0x12da   :  { %v1061_v61 = vmul.f32 %v1552_v58, %v1059_v59 }
0x12dc   :  { %1063 = vrot.lane.b32.xlu0 %v1061_v61, %s1641_s16 }
0x134e   :  { %v1064_v3 = vpop.permute.xlu0 %1063 }
0x134f   :  { %v1066_v1 = vadd.f32 %v1064_v3, %v1056_v2 }
0x1351   :  { %1553 = vtanh.f32 %v1066_v1 }
0x135b   :  { %v1554_v4 = vpop.eup %1553 }
0x135c   :  { %1069 = vrot.lane.b32.xlu1 %v1554_v4, %s1640_s15 }
0x13ce   :  { %v1070_v5 = vpop.permute.xlu1 %1069 }
0x13cf   :  { %v1072_v6 = vmul.f32 %v1552_v58, %v1070_v5 }
0x13d1   :  { %1075 = vrot.lane.b32.xlu0 %v1072_v6, %s1641_s16 }
0x1443   :  { %v1076_v7 = vpop.permute.xlu0 %1075 }
0x1444   :  { %1413 = vmatmul.mubr.msk.f32.vlgmr.msra.gmra.mrb[14].mxu1 %vm220_vm1, %v1076_v7 }
0x1517   :  { %v1145_v9 = vpop.f32.mrb[14].mxu1 }
0x1518   :  { %v1149_v12 = vadd.f32 %v1145_v9, %v347_v8  ;;  %v1414_v60 = vpop.f32.mrb[15].mxu1 }
0x151a   :  { %1555 = vtanh.f32 %v1149_v12  ;;  %v1228_v14 = vmul.f32 -1.442695, %v1149_v12 }
0x151c   :  { %1557 = vpow2.f32 %v1228_v14 }
0x1524   :  { %v1556_v13 = vpop.eup %1555 }
0x1525   :  { %1159 = vrot.lane.b32.xlu1 %v1556_v13, %s1640_s15 }
0x1526   :  { %v1558_v15 = vpop.eup %1557 }
0x1527   :  { %v1153_v16 = vadd.f32 1.0, %v1558_v15 }
0x1529   :  { %1559 = vrcp.f32 %v1153_v16 }
0x1533   :  { %v1560_v17 = vpop.eup %1559 }
0x1534   :  { %v1157_v21 = vmul.f32 %v1560_v17, %v1066_v1 }
0x1597   :  { %v1160_v18 = vpop.permute.xlu1 %1159 }
0x1598   :  { %v1162_v20 = vmul.f32 %v1560_v17, %v1160_v18 }
0x159a   :  { %1164 = vrot.lane.b32.xlu0 %v1162_v20, %s1641_s16 }
0x160c   :  { %v1165_v22 = vpop.permute.xlu0 %1164 }
0x160d   :  { %v1167_v53 = vadd.f32 %v1165_v22, %v1157_v21 }
0x160f   :  { %1561 = vtanh.f32 %v1167_v53 }
0x1619   :  { %v1562_v0 = vpop.eup %1561 }
0x161a   :  { %1170 = vrot.lane.b32.xlu1 %v1562_v0, %s1640_s15 }
0x168c   :  { %v1171_v23 = vpop.permute.xlu1 %1170 }
0x168d   :  { %v1173_v24 = vmul.f32 %v1560_v17, %v1171_v23 }
0x168f   :  { %1175 = vrot.lane.b32.xlu0 %v1173_v24, %s1641_s16 }
0x1701   :  { %v1176_v26 = vpop.permute.xlu0 %1175 }
0x1702   :  { %1178 = vst.msk [vmem:[#allocation8] sm:$0xff] %vm220_vm1, %v1176_v26 }
0x1703   :  { %1618 = shalt.err (!%p1615_p6)
}
0x1704   :  { %s1619_s21 = scalar_lea.hbm %s1930_s8, 128 }
0x1705   :  { %p1620_p7 = scmp.ne.s32.totalorder %s1930_s8, %s1619_s21  ;;  %p1623_p8 = scmp.lt.u32.totalorder %s1619_s21, %s1930_s8 }
0x1707   :  { %p1625_p9 = pnand %p1623_p8, %p1620_p7 }
0x1709   :  { %1628 = shalt.err (!%p1625_p9)
}
0x170a   :  { %1188 = dma.vmem_to_hbm [thread:$0]  %s1186_s17, 128, %s1930_s8, [#allocation5]  }
0x170b   :  { %1633 = dma.done.wait [#allocation5], 128  }
0x170c   :  { %1634 = vsyncadd [#allocation5], 4294967168 }
0x170d   :  { %1192 = vsyncpa [#allocation4], 1 }
0x170e   :  { %1193 = vsyncpa [#allocation7], 1 }
0x170f   :  { %1194 = vsyncpa [#allocation5], 1 }

</bundles_post_ra>
